<compile_context>
chip_gen: v5e
topology: v5e:2x2
jax: 0.10.0
libtpu: 0.0.40
codegen_flags: <defaults>
</compile_context>

<pallas_src>
import functools

import jax
import jax.numpy as jnp
from jax.experimental import pallas as pl
from jax.experimental.pallas import tpu as pltpu


# ----------------------------- Pallas kernel --------------------------------

def _forward_attention_kernel(p_ref, w_ref, out_ref, *,
                              cout, a, mu, sigma1, sigma2, alpha, leak):
    # Single fused matmul: (2*Cout, Ktot) @ (Ktot, tm) -> [conv_f ; mask_f]
    acc = jnp.dot(w_ref[...], p_ref[...], preferred_element_type=jnp.float32)
    conv_f = acc[:cout, :]      # (Cout, tm)
    mask_f = acc[cout:, :]      # (Cout, tm)

    # GaussActivation (parameters are compile-time constants within clamp ranges)
    d = mask_f - mu
    d2 = d * d
    if sigma1 == sigma2:
        e = jnp.exp(-sigma1 * d2)          # shared EUP transcendental
        left = a * e
        right = 1.0 + (a - 1.0) * e
    else:
        left = a * jnp.exp(-sigma1 * d2)
        right = 1.0 + (a - 1.0) * jnp.exp(-sigma2 * d2)
    mask_activ = jnp.where(mask_f < mu, left, right)

    # convOut = convFeatures * maskActiv, then LeakyReLU(0.2)
    conv_out = conv_f * mask_activ
    feat = jnp.where(conv_out >= 0.0, conv_out, leak * conv_out)

    # MaskUpdate: relu(maskFeatures) ** alpha  ==  exp(alpha*log(x)) for x > 0, else 0
    pos = mask_f > 0.0
    safe = jnp.where(pos, mask_f, 1.0)
    mask_upd = jnp.where(pos, jnp.exp(alpha * jnp.log(safe)), 0.0)

    # Single lane-dense store of the combined (4*Cout, tm) slab.
    out_ref[...] = jnp.concatenate(
        [feat, mask_upd, conv_f, mask_activ], axis=0).astype(out_ref.dtype)


# ------------------------------- JAX glue ------------------------------------

def _round_up(x, m):
    return ((x + m - 1) // m) * m


def _im2col_t(x, K, stride, pad):
    """x: (N, C, H, W) -> (C*K*K, N*Ho*Wo), row order (c, kh, kw) matching
    torch weight.reshape(Cout, C*K*K); column order (n, ho, wo)."""
    N, C, H, W = x.shape
    xp = jnp.pad(x, ((0, 0), (0, 0), (pad, pad), (pad, pad)))
    Ho = (H + 2 * pad - K) // stride + 1
    Wo = (W + 2 * pad - K) // stride + 1
    cols = []
    for kh in range(K):
        for kw in range(K):
            patch = xp[:, :, kh:kh + stride * Ho:stride, kw:kw + stride * Wo:stride]
            cols.append(patch)                       # (N, C, Ho, Wo)
    col = jnp.stack(cols, axis=2)                    # (N, C, K*K, Ho, Wo)
    col = col.transpose(1, 2, 0, 3, 4)               # (C, K*K, N, Ho, Wo)
    col = col.reshape(C * K * K, N * Ho * Wo)
    return col, Ho, Wo


def forward_attention(input_features, input_masks, w_conv, w_mask,
                      *, kernel_size=4, stride=2, padding=1, tm=512):
    """ForwardAttention(...).forward for sample='down-4', bn=False,
    activ='leaky', bias=False.

    input_features: (N, Cin, H, W) float32 NCHW
    input_masks:    (N, Cm,  H, W) float32 NCHW (Cm = 3 if Cin == 4 else Cin)
    w_conv:         (Cout, Cin, K, K)
    w_mask:         (Cout, Cm,  K, K)
    Returns (features, maskUpdated, convPreF, maskActiv), each (N, Cout, Ho, Wo).
    """
    N, Cin, H, W = input_features.shape
    Cm = input_masks.shape[1]
    Cout = w_conv.shape[0]
    K = kernel_size

    px, Ho, Wo = _im2col_t(input_features, K, stride, padding)   # (Cin*K*K, M)
    pm, _, _ = _im2col_t(input_masks, K, stride, padding)        # (Cm*K*K,  M)
    M = N * Ho * Wo
    KX, KM = Cin * K * K, Cm * K * K
    Ktot = KX + KM

    # Lane-dense tile: >= 128, up to `tm`; pad M up so no divisibility assert.
    tm_eff = min(tm, _round_up(M, 128))
    M_pad = _round_up(M, tm_eff)
    grid_m = pl.cdiv(M_pad, tm_eff)

    p = jnp.concatenate([px, pm], axis=0)                        # (Ktot, M)
    if M_pad != M:
        p = jnp.pad(p, ((0, 0), (0, M_pad - M)))                 # zero cols are benign
    p = p.astype(jnp.bfloat16)

    # Block-diagonal fused weight: [ wx 0 ; 0 wm ]  -> (2*Cout, Ktot)
    wcomb = jnp.zeros((2 * Cout, Ktot), jnp.float32)
    wcomb = wcomb.at[:Cout, :KX].set(w_conv.reshape(Cout, KX).astype(jnp.float32))
    wcomb = wcomb.at[Cout:, KX:].set(w_mask.reshape(Cout, KM).astype(jnp.float32))
    wcomb = wcomb.astype(jnp.bfloat16)

    kernel = functools.partial(
        _forward_attention_kernel, cout=Cout,
        a=1.1, mu=2.0, sigma1=1.0, sigma2=1.0, alpha=0.8, leak=0.2)

    out = pl.pallas_call(
        kernel,
        out_shape=jax.ShapeDtypeStruct((4 * Cout, M_pad), jnp.float32),
        grid_spec=pltpu.PrefetchScalarGridSpec(
            num_scalar_prefetch=0,
            grid=(grid_m,),
            in_specs=[
                pl.BlockSpec((Ktot, tm_eff), lambda i: (0, i)),
                pl.BlockSpec((2 * Cout, Ktot), lambda i: (0, 0)),
            ],
            out_specs=pl.BlockSpec((4 * Cout, tm_eff), lambda i: (0, i)),
        ),
        compiler_params=pltpu.CompilerParams(
            dimension_semantics=("parallel",)),
    )(p, wcomb)

    out = out[:, :M]                                   # drop pad columns
    feat, mask_upd, conv_pre, mask_activ = jnp.split(out, 4, axis=0)

    def to_nchw(x):                                    # (Cout, M) -> (N, Cout, Ho, Wo)
        return x.reshape(Cout, N, Ho, Wo).transpose(1, 0, 2, 3)

    return to_nchw(feat), to_nchw(mask_upd), to_nchw(conv_pre), to_nchw(mask_activ)


# ------------------------------- reference -----------------------------------

def _reference(input_features, input_masks, w_conv, w_mask,
               kernel_size=4, stride=2, padding=1):
    dn = jax.lax.conv_dimension_numbers(input_features.shape, w_conv.shape,
                                        ("NCHW", "OIHW", "NCHW"))
    conv_f = jax.lax.conv_general_dilated(
        input_features, w_conv, (stride, stride),
        [(padding, padding), (padding, padding)], dimension_numbers=dn)
    dn_m = jax.lax.conv_dimension_numbers(input_masks.shape, w_mask.shape,
                                          ("NCHW", "OIHW", "NCHW"))
    mask_f = jax.lax.conv_general_dilated(
        input_masks, w_mask, (stride, stride),
        [(padding, padding), (padding, padding)], dimension_numbers=dn_m)
    a, mu, s1, s2 = 1.1, 2.0, 1.0, 1.0
    d2 = (mask_f - mu) ** 2
    mask_activ = jnp.where(mask_f < mu, a * jnp.exp(-s1 * d2),
                           1.0 + (a - 1.0) * jnp.exp(-s2 * d2))
    conv_out = conv_f * mask_activ
    feat = jnp.where(conv_out >= 0.0, conv_out, 0.2 * conv_out)
    mask_upd = jnp.power(jnp.maximum(mask_f, 0.0), 0.8)
    return feat, mask_upd, conv_f, mask_activ


# --------------------------------- main ---------------------------------------

if __name__ == "__main__":
    key = jax.random.PRNGKey(0)
    k1, k2, k3, k4 = jax.random.split(key, 4)

    N, Cin, H, W = 2, 4, 16, 16
    Cm = 3 if Cin == 4 else Cin          # matches ForwardAttentionLayer logic
    Cout, K = 8, 4                       # sample='down-4' -> K=4, stride=2, pad=1

    x = jax.random.normal(k1, (N, Cin, H, W), dtype=jnp.float32)
    m = jax.random.uniform(k2, (N, Cm, H, W), dtype=jnp.float32)

    # weights_init('gaussian'): N(0, 0.02), bias=False
    w_conv = 0.02 * jax.random.normal(k3, (Cout, Cin, K, K), dtype=jnp.float32)
    w_mask = 0.02 * jax.random.normal(k4, (Cout, Cm, K, K), dtype=jnp.float32)

    outs = forward_attention(x, m, w_conv, w_mask)
    outs = jax.block_until_ready(outs)

    refs = _reference(x, m, w_conv, w_mask)
    # bf16 matmul inputs -> loosened tolerance vs f32 reference.
    for o, r in zip(outs, refs):
        assert o.shape == r.shape, (o.shape, r.shape)
        assert jnp.max(jnp.abs(o - r)) < 1e-2, float(jnp.max(jnp.abs(o - r)))

    print("KERNEL_OK")
</pallas_src>

<mosaic_0001>
module attributes {stable_mosaic.version = 11 : i64} {
  func.func @_forward_attention_kernel(%arg0: i32, %arg1: memref<112x128xbf16, #tpu.memory_space<vmem>>, %arg2: memref<16x112xbf16, #tpu.memory_space<vmem>>, %arg3: memref<32x128xf32, #tpu.memory_space<vmem>>) attributes {dimension_semantics = [#tpu.dimension_semantics<parallel>], iteration_bounds = array<i64: 1>, scalar_prefetch = 0 : i64, scratch_operands = 0 : i64, tpu.core_type = #tpu.core_type<tc>, window_params = [{transform_indices = @transform_0, window_bounds = array<i64: 112, 128>}, {pipeline_mode = #tpu.pipeline_mode<synchronous>, transform_indices = @transform_1, window_bounds = array<i64: 16, 112>}, {transform_indices = @transform_2, window_bounds = array<i64: 32, 128>}]} {
    %c0 = arith.constant 0 : index
    %c0_0 = arith.constant 0 : index
    %0 = vector.load %arg2[%c0, %c0_0] : memref<16x112xbf16, #tpu.memory_space<vmem>>, vector<16x112xbf16>
    %c0_1 = arith.constant 0 : index
    %c0_2 = arith.constant 0 : index
    %1 = vector.load %arg1[%c0_1, %c0_2] : memref<112x128xbf16, #tpu.memory_space<vmem>>, vector<112x128xbf16>
    %cst = arith.constant dense<0.000000e+00> : vector<16x128xf32>
    %2 = tpu.matmul %0, %1, %cst {dimension_numbers = #tpu.dot_dimension_numbers<[1], [0], [0], [1], [0, 0, 1, 1], [], []>} : vector<16x112xbf16>, vector<112x128xbf16>, vector<16x128xf32> -> vector<16x128xf32>
    %3 = vector.extract_strided_slice %2 {offsets = [0, 0], sizes = [8, 128], strides = [1, 1]} : vector<16x128xf32> to vector<8x128xf32>
    %4 = vector.extract_strided_slice %2 {offsets = [8, 0], sizes = [8, 128], strides = [1, 1]} : vector<16x128xf32> to vector<8x128xf32>
    %cst_3 = arith.constant 2.000000e+00 : f32
    %5 = vector.broadcast %cst_3 : f32 to vector<8x128xf32>
    %6 = arith.subf %4, %5 : vector<8x128xf32>
    %7 = arith.mulf %6, %6 : vector<8x128xf32>
    %cst_4 = arith.constant -1.000000e+00 : f32
    %8 = vector.broadcast %cst_4 : f32 to vector<8x128xf32>
    %9 = arith.mulf %8, %7 : vector<8x128xf32>
    %10 = math.exp %9 : vector<8x128xf32>
    %cst_5 = arith.constant 1.100000e+00 : f32
    %11 = vector.broadcast %cst_5 : f32 to vector<8x128xf32>
    %12 = arith.mulf %11, %10 : vector<8x128xf32>
    %cst_6 = arith.constant 1.000000e-01 : f32
    %13 = vector.broadcast %cst_6 : f32 to vector<8x128xf32>
    %14 = arith.mulf %13, %10 : vector<8x128xf32>
    %cst_7 = arith.constant 1.000000e+00 : f32
    %15 = vector.broadcast %cst_7 : f32 to vector<8x128xf32>
    %16 = arith.addf %15, %14 : vector<8x128xf32>
    %cst_8 = arith.constant 2.000000e+00 : f32
    %17 = vector.broadcast %cst_8 : f32 to vector<8x128xf32>
    %18 = arith.cmpf olt, %4, %17 : vector<8x128xf32>
    %19 = arith.select %18, %12, %16 : vector<8x128xi1>, vector<8x128xf32>
    %20 = arith.mulf %3, %19 : vector<8x128xf32>
    %cst_9 = arith.constant 0.000000e+00 : f32
    %21 = vector.broadcast %cst_9 : f32 to vector<8x128xf32>
    %22 = arith.cmpf oge, %20, %21 : vector<8x128xf32>
    %cst_10 = arith.constant 2.000000e-01 : f32
    %23 = vector.broadcast %cst_10 : f32 to vector<8x128xf32>
    %24 = arith.mulf %23, %20 : vector<8x128xf32>
    %25 = arith.select %22, %20, %24 : vector<8x128xi1>, vector<8x128xf32>
    %cst_11 = arith.constant 0.000000e+00 : f32
    %26 = vector.broadcast %cst_11 : f32 to vector<8x128xf32>
    %27 = arith.cmpf ogt, %4, %26 : vector<8x128xf32>
    %cst_12 = arith.constant 1.000000e+00 : f32
    %28 = vector.broadcast %cst_12 : f32 to vector<8x128xf32>
    %29 = arith.select %27, %4, %28 : vector<8x128xi1>, vector<8x128xf32>
    %30 = math.log %29 : vector<8x128xf32>
    %cst_13 = arith.constant 8.000000e-01 : f32
    %31 = vector.broadcast %cst_13 : f32 to vector<8x128xf32>
    %32 = arith.mulf %31, %30 : vector<8x128xf32>
    %33 = math.exp %32 : vector<8x128xf32>
    %cst_14 = arith.constant 0.000000e+00 : f32
    %34 = vector.broadcast %cst_14 : f32 to vector<8x128xf32>
    %35 = arith.select %27, %33, %34 : vector<8x128xi1>, vector<8x128xf32>
    %36 = tpu.concatenate %25, %35, %3, %19 in 0 : vector<8x128xf32>, vector<8x128xf32>, vector<8x128xf32>, vector<8x128xf32> -> vector<32x128xf32>
    %c0_15 = arith.constant 0 : index
    %c0_16 = arith.constant 0 : index
    %37 = vector.load %arg3[%c0_15, %c0_16] : memref<32x128xf32, #tpu.memory_space<vmem>>, vector<32x128xf32>
    tpu.vector_store %arg3[%c0_15, %c0_16], %36 {strides = array<i32>} : memref<32x128xf32, #tpu.memory_space<vmem>>, vector<32x128xf32>,
    return
  }
  func.func @transform_0(%arg0: i32) -> (i32, i32) {
    %c0_i32 = arith.constant 0 : i32
    %c0_i32_0 = arith.constant 0 : i32
    return %c0_i32, %arg0 : i32, i32
  }
  func.func @transform_1(%arg0: i32) -> (i32, i32) {
    %c0_i32 = arith.constant 0 : i32
    %c0_i32_0 = arith.constant 0 : i32
    %c0_i32_1 = arith.constant 0 : i32
    return %c0_i32, %c0_i32_0 : i32, i32
  }
  func.func @transform_2(%arg0: i32) -> (i32, i32) {
    %c0_i32 = arith.constant 0 : i32
    %c0_i32_0 = arith.constant 0 : i32
    return %c0_i32, %arg0 : i32, i32
  }
}

</mosaic_0001>

<bundles_post_ra>
// kernel: tpu_custom_call.1
= control target key start
LH: loop header
LB: loop body
LE: loop exit
PB: predicated region body
PF: predicated region fallthrough
CT: control target
= control target key end

     0   :  { %7 = vsyncpa [#allocation3], 0  ;;  %s338_s0 = inlined_call_operand.hbm [shape: bf16[112,128], index: 0, kind: input, shape index: {}]   ;;  %s339_s1 = inlined_call_operand.hbm [shape: bf16[16,112], index: 1, kind: input, shape index: {}]   ;;  %s340_s2 = inlined_call_operand.hbm [shape: f32[32,128], index: 2, kind: output, shape index: {}]  }
   0x1   :  { %8 = vsyncpa [#allocation6], 0 }
   0x2   :  { %9 = vsyncpa [#allocation4], 0  ;;  %s14_s11 = sshll.u32 %s338_s0, 4  ;;  %s305_s12 = smov [#allocation2]   ;;  %s15_s11 = int_to_ptr.hbm [resolvable:$true] %s14_s11 }
   0x3   :  { %s16_s13 = sshll.u32 %s305_s12, 4  ;;  %s27_s16 = sshll.u32 %s339_s1, 4  ;;  %s17_s13 = int_to_ptr.vmem [resolvable:$true] %s16_s13  ;;  %s28_s16 = int_to_ptr.hbm [resolvable:$true] %s27_s16 }
   0x4   :  { %s306_s17 = smov 64   ;;  %s307_s18 = smov 4  }
   0x5   :  { %22 = dma.hbm_to_vmem [thread:$0]  %s15_s11, 896, %s17_s13, [#allocation3], %s306_s17, %s306_s17, %s307_s18  }
   0x6   :  { %s308_s19 = smov [#allocation5]  }
   0x7   :  { %s29_s20 = sshll.u32 %s308_s19, 4  ;;  %s30_s20 = int_to_ptr.vmem [resolvable:$true] %s29_s20 }
   0x8   :  { %35 = dma.hbm_to_vmem [thread:$0]  %s28_s16, 128, %s30_s20, [#allocation6], %s306_s17, %s306_s17, %s307_s18  }
   0x9   :  { %299 = dma.done.wait [#allocation3], 896  }
   0xa   :  { %300 = vsyncadd [#allocation3], 4294966400 }
   0xb   :  { %301 = dma.done.wait [#allocation6], 128  }
   0xc   :  { %302 = vsyncadd [#allocation6], 4294967168  ;;  %v213_v0 = vld [vmem:[#allocation2 + $0x30] sm:$0xff]  ;;  %v212_v1 = vld [vmem:[#allocation2 + $0x28] sm:$0xff]  ;;  %vm108_vm0 = vcmask 916480   ;;  %s309_s0 = smov [#allocation7]  }
   0xd   :  { %113 = vmatpush.bf16.msra.mxu0 %v213_v0  ;;  %v211_v2 = vld [vmem:[#allocation2 + $0x20] sm:$0xff]  ;;  %v210_v3 = vld [vmem:[#allocation2 + $0x18] sm:$0xff]  ;;  %v209_v4 = vld [vmem:[#allocation2 + $0x10] sm:$0xff]  ;;  %s156_s1 = sshll.u32 %s309_s0, 4  ;;  %s158_s23 = sshll.u32 %s340_s2, 4  ;;  %s157_s1 = int_to_ptr.vmem [resolvable:$true] %s156_s1  ;;  %s159_s23 = int_to_ptr.hbm [resolvable:$true] %s158_s23 }
   0xe   :  { %v208_v5 = vld [vmem:[#allocation2 + $0x8] sm:$0xff]  ;;  %v207_v6 = vld [vmem:[#allocation2] sm:$0xff]  ;;  %v206_v7 = vld [vmem:[#allocation5] sm:$0xff]  ;;  %s310_s24 = smov 128   ;;  %s311_s25 = smov 8  }
  0x11   :  { %114 = vmatpush.bf16.msra.mxu0 %v212_v1 }
  0x15   :  { %115 = vmatpush.bf16.msra.mxu0 %v211_v2 }
  0x19   :  { %116 = vmatpush.bf16.msra.mxu0 %v210_v3 }
  0x1d   :  { %117 = vmatpush.bf16.msra.mxu0 %v209_v4 }
  0x21   :  { %118 = vmatpush.bf16.msra.mxu0 %v208_v5 }
  0x25   :  { %119 = vmatpush.bf16.msra.mxu0 %v207_v6 }
  0x28   :  { %204 = vmatmul.msk.bf16.vlgmr.msra.gmra.mxu0 %vm108_vm0, %v206_v7 }
  0xa5   :  { %v121_v8 = vpop.f32.mrf.mxu0 }
  0xa6   :  { %150 = vst [vmem:[#allocation7 + $0x10] sm:$0xff] %v121_v8 }
  0xad   :  { %v123_v9 = vpop.f32.mrf.mxu0 }
  0xae   :  { %v205_v10 = vadd.f32 -2.0, %v123_v9  ;;  %vm140_vm1 = vcmp.gt.f32.partialorder %v123_v9, 0.0  ;;  %vm134_vm2 = vcmp.lt.f32.partialorder %v123_v9, 2.0 }
  0xaf   :  { %v141_v11 = vsel %vm140_vm1, %v123_v9, 1.0 }
  0xb0   :  { %v127_v12 = vmul.f32 %v205_v10, %v205_v10  ;;  %221 = vlog2.f32 %v141_v11 }
  0xb2   :  { %v128_v13 = vmul.f32 -1.0, %v127_v12 }
  0xb4   :  { %v129_v14 = vmul.f32 1.442695, %v128_v13 }
  0xb6   :  { %v222_v15 = vpop.eup %221  ;;  %223 = vpow2.f32 %v129_v14 }
  0xb7   :  { %v143_v16 = vmul.f32 0.6931472, %v222_v15 }
  0xb9   :  { %v144_v17 = vmul.f32 0.8, %v143_v16 }
  0xbb   :  { %v145_v18 = vmul.f32 1.442695, %v144_v17 }
  0xbc   :  { %v224_v19 = vpop.eup %223 }
  0xbd   :  { %v132_v20 = vmul.f32 0.1, %v224_v19  ;;  %225 = vpow2.f32 %v145_v18  ;;  %v131_v21 = vmul.f32 1.1, %v224_v19 }
  0xbf   :  { %v133_v22 = vadd.f32 1.0, %v132_v20 }
  0xc1   :  { %v135_v23 = vsel %vm134_vm2, %v131_v21, %v133_v22 }
  0xc2   :  { %v136_v24 = vmul.f32 %v135_v23, %v121_v8  ;;  %151 = vst [vmem:[#allocation7 + $0x18] sm:$0xff] %v135_v23 }
  0xc3   :  { %v226_v25 = vpop.eup %225 }
  0xc4   :  { %vm137_vm3 = vcmp.ge.f32.partialorder %v136_v24, 0.0  ;;  %v138_v26 = vmul.f32 0.2, %v136_v24  ;;  %v147_v27 = vsel %vm140_vm1, %v226_v25, 0.0 }
  0xc5   :  { %149 = vst [vmem:[#allocation7 + $0x8] sm:$0xff] %v147_v27 }
  0xc6   :  { %v139_v28 = vsel %vm137_vm3, %v136_v24, %v138_v26 }
  0xc7   :  { %148 = vst [vmem:[#allocation7] sm:$0xff] %v139_v28 }
  0xc8   :  { %164 = dma.vmem_to_hbm [thread:$0]  %s157_s1, 512, %s159_s23, [#allocation4], %s310_s24, %s310_s24, %s311_s25  }
  0xc9   :  { %303 = dma.done.wait [#allocation4], 512  }
  0xca   :  { %304 = vsyncadd [#allocation4], 4294966784 }
  0xcb   :  { %169 = vsyncpa [#allocation3], 1 }
  0xcc   :  { %170 = vsyncpa [#allocation6], 1 }
  0xcd   :  { %171 = vsyncpa [#allocation4], 1 }

</bundles_post_ra>
